<compile_context>
chip_gen: v6e
topology: v6e:2x2x1
jax: 0.10.0
libtpu: 0.0.40
codegen_flags: <defaults>
</compile_context>

<pallas_src>
from functools import partial

import jax
import jax.numpy as jnp
from jax.experimental import pallas as pl
from jax.experimental.pallas import tpu as pltpu

EPS = 1e-5


def less_block_kernel(x_ref, sup_ref, sdn_ref,
                      a1_ref, b1_ref, g1_ref, be1_ref,
                      a2_ref, b2_ref, g2_ref, be2_ref,
                      pool_ref, bcast_ref, o_ref, *, inv_cnt):
    """Fused (conv3x3 -> BN -> ReLU) x2 on a lane-dense (N*H, W*C) slab."""
    f32 = jnp.float32
    sup = sup_ref[...]        # (NH, NH): picks row h-1 of the same image, else 0
    sdn = sdn_ref[...]        # (NH, NH): picks row h+1 of the same image, else 0
    pool = pool_ref[...]      # (W*C, C): sums the W lane-copies of each channel
    bcast = bcast_ref[...]    # (C, W*C): broadcasts a per-channel vec over W

    def conv3x3(x, a_ref, b_row):
        # H shift + zero halo via the shift matrices; W shift + zero halo is
        # baked into the banded A[dy] matrices.  5 lane-dense MXU matmuls.
        up = jnp.dot(sup, x, preferred_element_type=f32)      # x[n, h-1] or 0
        dn = jnp.dot(sdn, x, preferred_element_type=f32)      # x[n, h+1] or 0
        acc = jnp.dot(up, a_ref[0], preferred_element_type=f32)
        acc = acc + jnp.dot(x, a_ref[1], preferred_element_type=f32)
        acc = acc + jnp.dot(dn, a_ref[2], preferred_element_type=f32)
        return acc + b_row

    def bn_relu(acc, g_row, be_row):
        # Train-mode BatchNorm (biased batch variance) folded into one FMA.
        s = jnp.sum(acc, axis=0, keepdims=True)                            # (1, W*C)
        mean_c = jnp.dot(s, pool, preferred_element_type=f32) * inv_cnt    # (1, C)
        d = acc - jnp.dot(mean_c, bcast, preferred_element_type=f32)
        v = jnp.sum(d * d, axis=0, keepdims=True)                          # (1, W*C)
        var_c = jnp.dot(v, pool, preferred_element_type=f32) * inv_cnt     # (1, C)
        scale_c = g_row * jax.lax.rsqrt(var_c + EPS)                       # (1, C)
        bias_c = be_row - mean_c * scale_c                                 # (1, C)
        scale = jnp.dot(scale_c, bcast, preferred_element_type=f32)        # (1, W*C)
        bias = jnp.dot(bias_c, bcast, preferred_element_type=f32)          # (1, W*C)
        return jnp.maximum(acc * scale + bias, 0.0)

    x = x_ref[...]                                                         # (NH, W*Cin)
    h1 = bn_relu(conv3x3(x, a1_ref, b1_ref[...]), g1_ref[...], be1_ref[...])
    h2 = bn_relu(conv3x3(h1, a2_ref, b2_ref[...]), g2_ref[...], be2_ref[...])
    o_ref[...] = h2                                                        # lane-dense store


# ---------------- wrapper-side constant preprocessing (layout plumbing) ----

def _banded_conv_weights(w_hwio, W):
    """(3,3,Ci,Co) -> (3, W*Ci, W*Co): fold the W shift + zero-pad into weights.

    A[dy, wi*Ci+ci, wo*Co+co] = w[dy, wi-wo+1, ci, co] if 0 <= wi-wo+1 < 3 else 0
    """
    kh, kw, Ci, Co = w_hwio.shape
    wi = jnp.arange(W)[:, None]
    wo = jnp.arange(W)[None, :]
    dx = wi - wo + 1
    valid = ((dx >= 0) & (dx < kw)).astype(w_hwio.dtype)
    dxc = jnp.clip(dx, 0, kw - 1)
    blk = w_hwio[:, dxc] * valid[None, :, :, None, None]     # (kh, W, W, Ci, Co)
    return blk.transpose(0, 1, 3, 2, 4).reshape(kh, W * Ci, W * Co)


def _shift_matrices(N, H):
    """Row-shift matrices on the flattened (n, h) axis with zeroed image borders."""
    r = jnp.arange(N * H)
    h = r % H
    sup = ((r[:, None] - 1) == r[None, :]) & (h[:, None] != 0)
    sdn = ((r[:, None] + 1) == r[None, :]) & (h[:, None] != (H - 1))
    return sup.astype(jnp.float32), sdn.astype(jnp.float32)


def _pool_bcast(W, C):
    """(W*C, C) channel-pool matrix and its transpose for broadcasting."""
    eq = (jnp.arange(W * C)[:, None] % C) == jnp.arange(C)[None, :]
    pool = eq.astype(jnp.float32)
    return pool, pool.T


def less_block(x_nhwc, params, out_channels):
    """x_nhwc: (N, H, W, Cin) float32.  Returns (N, H, W, out_channels)."""
    w1, b1, g1, be1, w2, b2, g2, be2 = params
    N, H, W, Cin = x_nhwc.shape
    C = w1.shape[-1]
    assert C >= out_channels

    x2d = x_nhwc.reshape(N * H, W * Cin)              # free row-major reshape
    a1 = _banded_conv_weights(w1, W)                  # (3, W*Cin, W*C)
    a2 = _banded_conv_weights(w2, W)                  # (3, W*C,  W*C)
    sup, sdn = _shift_matrices(N, H)
    pool, bcast = _pool_bcast(W, C)
    b1r = jnp.tile(b1, W).reshape(1, W * C)
    b2r = jnp.tile(b2, W).reshape(1, W * C)
    g1r, be1r = g1.reshape(1, C), be1.reshape(1, C)
    g2r, be2r = g2.reshape(1, C), be2.reshape(1, C)

    kernel = partial(less_block_kernel, inv_cnt=1.0 / float(N * H * W))
    vmem = pl.BlockSpec(memory_space=pltpu.MemorySpace.VMEM)

    out2d = pl.pallas_call(
        kernel,
        out_shape=jax.ShapeDtypeStruct((N * H, W * C), jnp.float32),
        in_specs=[vmem] * 13,
        out_specs=vmem,
    )(x2d, sup, sdn, a1, b1r, g1r, be1r, a2, b2r, g2r, be2r, pool, bcast)

    # Channel slice in the wrapper so kernel stores stay lane-dense.
    return out2d.reshape(N, H, W, C)[..., :out_channels]


# ---------------- pure-JAX reference of the PyTorch forward ----------------

def reference(x_nhwc, params, out_channels):
    w1, b1, g1, be1, w2, b2, g2, be2 = params

    def conv(h, w, b):
        y = jax.lax.conv_general_dilated(
            h, w, window_strides=(1, 1), padding=((1, 1), (1, 1)),
            dimension_numbers=('NHWC', 'HWIO', 'NHWC'))
        return y + b

    def bn(h, g, be):
        m = jnp.mean(h, axis=(0, 1, 2), keepdims=True)
        v = jnp.mean((h - m) ** 2, axis=(0, 1, 2), keepdims=True)
        return (h - m) * jax.lax.rsqrt(v + EPS) * g + be

    h = jax.nn.relu(bn(conv(x_nhwc, w1, b1), g1, be1))
    h = jax.nn.relu(bn(conv(h, w2, b2), g2, be2))
    return h[..., :out_channels]


def make_params(key, in_channels, create_channels):
    ks = jax.random.split(key, 8)
    C, Cin = create_channels, in_channels
    w1 = 0.1 * jax.random.normal(ks[0], (3, 3, Cin, C), jnp.float32)
    b1 = 0.1 * jax.random.normal(ks[1], (C,), jnp.float32)
    g1 = 1.0 + 0.1 * jax.random.normal(ks[2], (C,), jnp.float32)
    be1 = 0.1 * jax.random.normal(ks[3], (C,), jnp.float32)
    w2 = 0.1 * jax.random.normal(ks[4], (3, 3, C, C), jnp.float32)
    b2 = 0.1 * jax.random.normal(ks[5], (C,), jnp.float32)
    g2 = 1.0 + 0.1 * jax.random.normal(ks[6], (C,), jnp.float32)
    be2 = 0.1 * jax.random.normal(ks[7], (C,), jnp.float32)
    return (w1, b1, g1, be1, w2, b2, g2, be2)


if __name__ == "__main__":
    # LessBlock(in_channels=4, create_channels=8, out_channels=6)
    N, H, W = 2, 16, 16
    in_channels, create_channels, out_channels = 4, 8, 6

    key = jax.random.PRNGKey(0)
    kx, kp = jax.random.split(key)
    x = jax.random.normal(kx, (N, H, W, in_channels), jnp.float32)  # NHWC
    params = make_params(kp, in_channels, create_channels)

    out = less_block(x, params, out_channels)
    out = jax.block_until_ready(out)

    ref = reference(x, params, out_channels)
    err = float(jnp.max(jnp.abs(out - ref)))
    assert out.shape == (N, H, W, out_channels)
    assert err < 1e-3, f"mismatch vs reference: {err}"   # f32 matmul-order slack
    print("KERNEL_OK")
</pallas_src>

<mosaic_0001>
module attributes {stable_mosaic.version = 11 : i64} {
  func.func @less_block_kernel(%arg0: memref<32x64xf32, #tpu.memory_space<vmem>>, %arg1: memref<32x32xf32, #tpu.memory_space<vmem>>, %arg2: memref<32x32xf32, #tpu.memory_space<vmem>>, %arg3: memref<3x64x128xf32, #tpu.memory_space<vmem>>, %arg4: memref<1x128xf32, #tpu.memory_space<vmem>>, %arg5: memref<1x8xf32, #tpu.memory_space<vmem>>, %arg6: memref<1x8xf32, #tpu.memory_space<vmem>>, %arg7: memref<3x128x128xf32, #tpu.memory_space<vmem>>, %arg8: memref<1x128xf32, #tpu.memory_space<vmem>>, %arg9: memref<1x8xf32, #tpu.memory_space<vmem>>, %arg10: memref<1x8xf32, #tpu.memory_space<vmem>>, %arg11: memref<128x8xf32, #tpu.memory_space<vmem>>, %arg12: memref<8x128xf32, #tpu.memory_space<vmem>>, %arg13: memref<32x128xf32, #tpu.memory_space<vmem>>) attributes {dimension_semantics = [], scalar_prefetch = 0 : i64, scratch_operands = 0 : i64, tpu.core_type = #tpu.core_type<tc>} {
    %c0 = arith.constant 0 : index
    %c0_0 = arith.constant 0 : index
    %0 = vector.load %arg1[%c0, %c0_0] : memref<32x32xf32, #tpu.memory_space<vmem>>, vector<32x32xf32>
    %c0_1 = arith.constant 0 : index
    %c0_2 = arith.constant 0 : index
    %1 = vector.load %arg2[%c0_1, %c0_2] : memref<32x32xf32, #tpu.memory_space<vmem>>, vector<32x32xf32>
    %c0_3 = arith.constant 0 : index
    %c0_4 = arith.constant 0 : index
    %2 = vector.load %arg11[%c0_3, %c0_4] : memref<128x8xf32, #tpu.memory_space<vmem>>, vector<128x8xf32>
    %c0_5 = arith.constant 0 : index
    %c0_6 = arith.constant 0 : index
    %3 = vector.load %arg12[%c0_5, %c0_6] : memref<8x128xf32, #tpu.memory_space<vmem>>, vector<8x128xf32>
    %c0_7 = arith.constant 0 : index
    %c0_8 = arith.constant 0 : index
    %4 = vector.load %arg0[%c0_7, %c0_8] : memref<32x64xf32, #tpu.memory_space<vmem>>, vector<32x64xf32>
    %c0_9 = arith.constant 0 : index
    %c0_10 = arith.constant 0 : index
    %5 = vector.load %arg4[%c0_9, %c0_10] : memref<1x128xf32, #tpu.memory_space<vmem>>, vector<1x128xf32>
    %cst = arith.constant dense<0.000000e+00> : vector<32x64xf32>
    %6 = tpu.matmul %0, %4, %cst {dimension_numbers = #tpu.dot_dimension_numbers<[1], [0], [0], [1], [0, 0, 1, 1], [], []>} : vector<32x32xf32>, vector<32x64xf32>, vector<32x64xf32> -> vector<32x64xf32>
    %cst_11 = arith.constant dense<0.000000e+00> : vector<32x64xf32>
    %7 = tpu.matmul %1, %4, %cst_11 {dimension_numbers = #tpu.dot_dimension_numbers<[1], [0], [0], [1], [0, 0, 1, 1], [], []>} : vector<32x32xf32>, vector<32x64xf32>, vector<32x64xf32> -> vector<32x64xf32>
    %c0_12 = arith.constant 0 : index
    %c0_13 = arith.constant 0 : index
    %c0_14 = arith.constant 0 : index
    %8 = vector.load %arg3[%c0_12, %c0_13, %c0_14] : memref<3x64x128xf32, #tpu.memory_space<vmem>>, vector<1x64x128xf32>
    %9 = vector.shape_cast %8 : vector<1x64x128xf32> to vector<64x128xf32>
    %cst_15 = arith.constant dense<0.000000e+00> : vector<32x128xf32>
    %10 = tpu.matmul %6, %9, %cst_15 {dimension_numbers = #tpu.dot_dimension_numbers<[1], [0], [0], [1], [0, 0, 1, 1], [], []>} : vector<32x64xf32>, vector<64x128xf32>, vector<32x128xf32> -> vector<32x128xf32>
    %c1 = arith.constant 1 : index
    %c0_16 = arith.constant 0 : index
    %c0_17 = arith.constant 0 : index
    %11 = vector.load %arg3[%c1, %c0_16, %c0_17] : memref<3x64x128xf32, #tpu.memory_space<vmem>>, vector<1x64x128xf32>
    %12 = vector.shape_cast %11 : vector<1x64x128xf32> to vector<64x128xf32>
    %cst_18 = arith.constant dense<0.000000e+00> : vector<32x128xf32>
    %13 = tpu.matmul %4, %12, %cst_18 {dimension_numbers = #tpu.dot_dimension_numbers<[1], [0], [0], [1], [0, 0, 1, 1], [], []>} : vector<32x64xf32>, vector<64x128xf32>, vector<32x128xf32> -> vector<32x128xf32>
    %14 = arith.addf %10, %13 : vector<32x128xf32>
    %c2 = arith.constant 2 : index
    %c0_19 = arith.constant 0 : index
    %c0_20 = arith.constant 0 : index
    %15 = vector.load %arg3[%c2, %c0_19, %c0_20] : memref<3x64x128xf32, #tpu.memory_space<vmem>>, vector<1x64x128xf32>
    %16 = vector.shape_cast %15 : vector<1x64x128xf32> to vector<64x128xf32>
    %cst_21 = arith.constant dense<0.000000e+00> : vector<32x128xf32>
    %17 = tpu.matmul %7, %16, %cst_21 {dimension_numbers = #tpu.dot_dimension_numbers<[1], [0], [0], [1], [0, 0, 1, 1], [], []>} : vector<32x64xf32>, vector<64x128xf32>, vector<32x128xf32> -> vector<32x128xf32>
    %18 = arith.addf %14, %17 : vector<32x128xf32>
    %19 = vector.broadcast %5 : vector<1x128xf32> to vector<32x128xf32>
    %20 = arith.addf %18, %19 : vector<32x128xf32>
    %c0_22 = arith.constant 0 : index
    %c0_23 = arith.constant 0 : index
    %21 = vector.load %arg5[%c0_22, %c0_23] : memref<1x8xf32, #tpu.memory_space<vmem>>, vector<1x8xf32>
    %c0_24 = arith.constant 0 : index
    %c0_25 = arith.constant 0 : index
    %22 = vector.load %arg6[%c0_24, %c0_25] : memref<1x8xf32, #tpu.memory_space<vmem>>, vector<1x8xf32>
    %cst_26 = arith.constant dense<0.000000e+00> : vector<128xf32>
    %23 = vector.multi_reduction <add>, %20, %cst_26 [0] : vector<32x128xf32> to vector<128xf32>
    %24 = vector.shape_cast %23 : vector<128xf32> to vector<1x128xf32>
    %cst_27 = arith.constant dense<0.000000e+00> : vector<1x8xf32>
    %25 = tpu.matmul %24, %2, %cst_27 {dimension_numbers = #tpu.dot_dimension_numbers<[1], [0], [0], [1], [0, 0, 1, 1], [], []>} : vector<1x128xf32>, vector<128x8xf32>, vector<1x8xf32> -> vector<1x8xf32>
    %cst_28 = arith.constant 0.001953125 : f32
    %26 = vector.broadcast %cst_28 : f32 to vector<1x8xf32>
    %27 = arith.mulf %25, %26 : vector<1x8xf32>
    %cst_29 = arith.constant dense<0.000000e+00> : vector<1x128xf32>
    %28 = tpu.matmul %27, %3, %cst_29 {dimension_numbers = #tpu.dot_dimension_numbers<[1], [0], [0], [1], [0, 0, 1, 1], [], []>} : vector<1x8xf32>, vector<8x128xf32>, vector<1x128xf32> -> vector<1x128xf32>
    %29 = vector.broadcast %28 : vector<1x128xf32> to vector<32x128xf32>
    %30 = arith.subf %20, %29 : vector<32x128xf32>
    %31 = arith.mulf %30, %30 : vector<32x128xf32>
    %cst_30 = arith.constant dense<0.000000e+00> : vector<128xf32>
    %32 = vector.multi_reduction <add>, %31, %cst_30 [0] : vector<32x128xf32> to vector<128xf32>
    %33 = vector.shape_cast %32 : vector<128xf32> to vector<1x128xf32>
    %cst_31 = arith.constant dense<0.000000e+00> : vector<1x8xf32>
    %34 = tpu.matmul %33, %2, %cst_31 {dimension_numbers = #tpu.dot_dimension_numbers<[1], [0], [0], [1], [0, 0, 1, 1], [], []>} : vector<1x128xf32>, vector<128x8xf32>, vector<1x8xf32> -> vector<1x8xf32>
    %cst_32 = arith.constant 0.001953125 : f32
    %35 = vector.broadcast %cst_32 : f32 to vector<1x8xf32>
    %36 = arith.mulf %34, %35 : vector<1x8xf32>
    %cst_33 = arith.constant 9.99999974E-6 : f32
    %37 = vector.broadcast %cst_33 : f32 to vector<1x8xf32>
    %38 = arith.addf %36, %37 : vector<1x8xf32>
    %39 = math.rsqrt %38 : vector<1x8xf32>
    %40 = arith.mulf %21, %39 : vector<1x8xf32>
    %41 = arith.mulf %27, %40 : vector<1x8xf32>
    %42 = arith.subf %22, %41 : vector<1x8xf32>
    %cst_34 = arith.constant dense<0.000000e+00> : vector<1x128xf32>
    %43 = tpu.matmul %40, %3, %cst_34 {dimension_numbers = #tpu.dot_dimension_numbers<[1], [0], [0], [1], [0, 0, 1, 1], [], []>} : vector<1x8xf32>, vector<8x128xf32>, vector<1x128xf32> -> vector<1x128xf32>
    %cst_35 = arith.constant dense<0.000000e+00> : vector<1x128xf32>
    %44 = tpu.matmul %42, %3, %cst_35 {dimension_numbers = #tpu.dot_dimension_numbers<[1], [0], [0], [1], [0, 0, 1, 1], [], []>} : vector<1x8xf32>, vector<8x128xf32>, vector<1x128xf32> -> vector<1x128xf32>
    %45 = vector.broadcast %43 : vector<1x128xf32> to vector<32x128xf32>
    %46 = arith.mulf %20, %45 : vector<32x128xf32>
    %47 = vector.broadcast %44 : vector<1x128xf32> to vector<32x128xf32>
    %48 = arith.addf %46, %47 : vector<32x128xf32>
    %cst_36 = arith.constant 0.000000e+00 : f32
    %49 = vector.broadcast %cst_36 : f32 to vector<32x128xf32>
    %50 = arith.maximumf %48, %49 : vector<32x128xf32>
    %c0_37 = arith.constant 0 : index
    %c0_38 = arith.constant 0 : index
    %51 = vector.load %arg8[%c0_37, %c0_38] : memref<1x128xf32, #tpu.memory_space<vmem>>, vector<1x128xf32>
    %cst_39 = arith.constant dense<0.000000e+00> : vector<32x128xf32>
    %52 = tpu.matmul %0, %50, %cst_39 {dimension_numbers = #tpu.dot_dimension_numbers<[1], [0], [0], [1], [0, 0, 1, 1], [], []>} : vector<32x32xf32>, vector<32x128xf32>, vector<32x128xf32> -> vector<32x128xf32>
    %cst_40 = arith.constant dense<0.000000e+00> : vector<32x128xf32>
    %53 = tpu.matmul %1, %50, %cst_40 {dimension_numbers = #tpu.dot_dimension_numbers<[1], [0], [0], [1], [0, 0, 1, 1], [], []>} : vector<32x32xf32>, vector<32x128xf32>, vector<32x128xf32> -> vector<32x128xf32>
    %c0_41 = arith.constant 0 : index
    %c0_42 = arith.constant 0 : index
    %c0_43 = arith.constant 0 : index
    %54 = vector.load %arg7[%c0_41, %c0_42, %c0_43] : memref<3x128x128xf32, #tpu.memory_space<vmem>>, vector<1x128x128xf32>
    %55 = vector.shape_cast %54 : vector<1x128x128xf32> to vector<128x128xf32>
    %cst_44 = arith.constant dense<0.000000e+00> : vector<32x128xf32>
    %56 = tpu.matmul %52, %55, %cst_44 {dimension_numbers = #tpu.dot_dimension_numbers<[1], [0], [0], [1], [0, 0, 1, 1], [], []>} : vector<32x128xf32>, vector<128x128xf32>, vector<32x128xf32> -> vector<32x128xf32>
    %c1_45 = arith.constant 1 : index
    %c0_46 = arith.constant 0 : index
    %c0_47 = arith.constant 0 : index
    %57 = vector.load %arg7[%c1_45, %c0_46, %c0_47] : memref<3x128x128xf32, #tpu.memory_space<vmem>>, vector<1x128x128xf32>
    %58 = vector.shape_cast %57 : vector<1x128x128xf32> to vector<128x128xf32>
    %cst_48 = arith.constant dense<0.000000e+00> : vector<32x128xf32>
    %59 = tpu.matmul %50, %58, %cst_48 {dimension_numbers = #tpu.dot_dimension_numbers<[1], [0], [0], [1], [0, 0, 1, 1], [], []>} : vector<32x128xf32>, vector<128x128xf32>, vector<32x128xf32> -> vector<32x128xf32>
    %60 = arith.addf %56, %59 : vector<32x128xf32>
    %c2_49 = arith.constant 2 : index
    %c0_50 = arith.constant 0 : index
    %c0_51 = arith.constant 0 : index
    %61 = vector.load %arg7[%c2_49, %c0_50, %c0_51] : memref<3x128x128xf32, #tpu.memory_space<vmem>>, vector<1x128x128xf32>
    %62 = vector.shape_cast %61 : vector<1x128x128xf32> to vector<128x128xf32>
    %cst_52 = arith.constant dense<0.000000e+00> : vector<32x128xf32>
    %63 = tpu.matmul %53, %62, %cst_52 {dimension_numbers = #tpu.dot_dimension_numbers<[1], [0], [0], [1], [0, 0, 1, 1], [], []>} : vector<32x128xf32>, vector<128x128xf32>, vector<32x128xf32> -> vector<32x128xf32>
    %64 = arith.addf %60, %63 : vector<32x128xf32>
    %65 = vector.broadcast %51 : vector<1x128xf32> to vector<32x128xf32>
    %66 = arith.addf %64, %65 : vector<32x128xf32>
    %c0_53 = arith.constant 0 : index
    %c0_54 = arith.constant 0 : index
    %67 = vector.load %arg9[%c0_53, %c0_54] : memref<1x8xf32, #tpu.memory_space<vmem>>, vector<1x8xf32>
    %c0_55 = arith.constant 0 : index
    %c0_56 = arith.constant 0 : index
    %68 = vector.load %arg10[%c0_55, %c0_56] : memref<1x8xf32, #tpu.memory_space<vmem>>, vector<1x8xf32>
    %cst_57 = arith.constant dense<0.000000e+00> : vector<128xf32>
    %69 = vector.multi_reduction <add>, %66, %cst_57 [0] : vector<32x128xf32> to vector<128xf32>
    %70 = vector.shape_cast %69 : vector<128xf32> to vector<1x128xf32>
    %cst_58 = arith.constant dense<0.000000e+00> : vector<1x8xf32>
    %71 = tpu.matmul %70, %2, %cst_58 {dimension_numbers = #tpu.dot_dimension_numbers<[1], [0], [0], [1], [0, 0, 1, 1], [], []>} : vector<1x128xf32>, vector<128x8xf32>, vector<1x8xf32> -> vector<1x8xf32>
    %cst_59 = arith.constant 0.001953125 : f32
    %72 = vector.broadcast %cst_59 : f32 to vector<1x8xf32>
    %73 = arith.mulf %71, %72 : vector<1x8xf32>
    %cst_60 = arith.constant dense<0.000000e+00> : vector<1x128xf32>
    %74 = tpu.matmul %73, %3, %cst_60 {dimension_numbers = #tpu.dot_dimension_numbers<[1], [0], [0], [1], [0, 0, 1, 1], [], []>} : vector<1x8xf32>, vector<8x128xf32>, vector<1x128xf32> -> vector<1x128xf32>
    %75 = vector.broadcast %74 : vector<1x128xf32> to vector<32x128xf32>
    %76 = arith.subf %66, %75 : vector<32x128xf32>
    %77 = arith.mulf %76, %76 : vector<32x128xf32>
    %cst_61 = arith.constant dense<0.000000e+00> : vector<128xf32>
    %78 = vector.multi_reduction <add>, %77, %cst_61 [0] : vector<32x128xf32> to vector<128xf32>
    %79 = vector.shape_cast %78 : vector<128xf32> to vector<1x128xf32>
    %cst_62 = arith.constant dense<0.000000e+00> : vector<1x8xf32>
    %80 = tpu.matmul %79, %2, %cst_62 {dimension_numbers = #tpu.dot_dimension_numbers<[1], [0], [0], [1], [0, 0, 1, 1], [], []>} : vector<1x128xf32>, vector<128x8xf32>, vector<1x8xf32> -> vector<1x8xf32>
    %cst_63 = arith.constant 0.001953125 : f32
    %81 = vector.broadcast %cst_63 : f32 to vector<1x8xf32>
    %82 = arith.mulf %80, %81 : vector<1x8xf32>
    %cst_64 = arith.constant 9.99999974E-6 : f32
    %83 = vector.broadcast %cst_64 : f32 to vector<1x8xf32>
    %84 = arith.addf %82, %83 : vector<1x8xf32>
    %85 = math.rsqrt %84 : vector<1x8xf32>
    %86 = arith.mulf %67, %85 : vector<1x8xf32>
    %87 = arith.mulf %73, %86 : vector<1x8xf32>
    %88 = arith.subf %68, %87 : vector<1x8xf32>
    %cst_65 = arith.constant dense<0.000000e+00> : vector<1x128xf32>
    %89 = tpu.matmul %86, %3, %cst_65 {dimension_numbers = #tpu.dot_dimension_numbers<[1], [0], [0], [1], [0, 0, 1, 1], [], []>} : vector<1x8xf32>, vector<8x128xf32>, vector<1x128xf32> -> vector<1x128xf32>
    %cst_66 = arith.constant dense<0.000000e+00> : vector<1x128xf32>
    %90 = tpu.matmul %88, %3, %cst_66 {dimension_numbers = #tpu.dot_dimension_numbers<[1], [0], [0], [1], [0, 0, 1, 1], [], []>} : vector<1x8xf32>, vector<8x128xf32>, vector<1x128xf32> -> vector<1x128xf32>
    %91 = vector.broadcast %89 : vector<1x128xf32> to vector<32x128xf32>
    %92 = arith.mulf %66, %91 : vector<32x128xf32>
    %93 = vector.broadcast %90 : vector<1x128xf32> to vector<32x128xf32>
    %94 = arith.addf %92, %93 : vector<32x128xf32>
    %cst_67 = arith.constant 0.000000e+00 : f32
    %95 = vector.broadcast %cst_67 : f32 to vector<32x128xf32>
    %96 = arith.maximumf %94, %95 : vector<32x128xf32>
    %c0_68 = arith.constant 0 : index
    %c0_69 = arith.constant 0 : index
    %97 = vector.load %arg13[%c0_68, %c0_69] : memref<32x128xf32, #tpu.memory_space<vmem>>, vector<32x128xf32>
    tpu.vector_store %arg13[%c0_68, %c0_69], %96 {strides = array<i32>} : memref<32x128xf32, #tpu.memory_space<vmem>>, vector<32x128xf32>,
    return
  }
}

</mosaic_0001>

<bundles_post_ra>
// kernel: tpu_custom_call.1
= control target key start
LH: loop header
LB: loop body
LE: loop exit
PB: predicated region body
PF: predicated region fallthrough
CT: control target
= control target key end

     0   :  { %18 = vsyncpa [#allocation3], 0  ;;  %s3239_s0 = inlined_call_operand.vmem [shape: f32[32,64], index: 0, kind: input, shape index: {}]   ;;  %s3240_s1 = inlined_call_operand.vmem [shape: f32[32,32], index: 1, kind: input, shape index: {}]   ;;  %s3241_s2 = inlined_call_operand.vmem [shape: f32[32,32], index: 2, kind: input, shape index: {}]   ;;  %s3242_s3 = inlined_call_operand.hbm [shape: f32[3,64,128], index: 3, kind: input, shape index: {}]   ;;  %s3243_s4 = inlined_call_operand.vmem [shape: f32[1,128], index: 4, kind: input, shape index: {}]   ;;  %s3244_s5 = inlined_call_operand.vmem [shape: f32[1,8], index: 5, kind: input, shape index: {}]   ;;  %s3245_s6 = inlined_call_operand.vmem [shape: f32[1,8], index: 6, kind: input, shape index: {}]   ;;  %s3246_s7 = inlined_call_operand.hbm [shape: f32[3,128,128], index: 7, kind: input, shape index: {}]   ;;  %s3247_s8 = inlined_call_operand.vmem [shape: f32[1,128], index: 8, kind: input, shape index: {}]   ;;  %s3248_s9 = inlined_call_operand.vmem [shape: f32[1,8], index: 9, kind: input, shape index: {}]   ;;  %s3249_s10 = inlined_call_operand.vmem [shape: f32[1,8], index: 10, kind: input, shape index: {}]   ;;  %s3250_s11 = inlined_call_operand.vmem [shape: f32[128,8], index: 11, kind: input, shape index: {}]   ;;  %s3251_s12 = inlined_call_operand.vmem [shape: f32[8,128], index: 12, kind: input, shape index: {}]   ;;  %s3252_s13 = inlined_call_operand.hbm [shape: f32[32,128], index: 13, kind: output, shape index: {}]  }
   0x1   :  { %19 = vsyncpa [#allocation6], 0 }
   0x2   :  { %20 = vsyncpa [#allocation4], 0  ;;  %s2706_s25 = smov [#allocation2]  }
   0x3   :  { %s32_s26 = sshll.u32 %s2706_s25, 4  ;;  %s33_s26 = int_to_ptr.vmem [resolvable:$true] %s32_s26 }
   0x4   :  { %s2648_s27 = scalar_lea.vmem %s33_s26, 3072  ;;  %p2653_p1 = scmp.lt.s32.totalorder %s33_s26, %s33_s26 }
   0x5   :  { %p2649_p0 = scmp.ne.s32.totalorder %s33_s26, %s2648_s27  ;;  %p2654_p2 = scmp.lt.s32.totalorder %s2648_s27, %s2648_s27 }
   0x7   :  { %p2655_p3 = por %p2654_p2, %p2653_p1 }
   0x9   :  { %p2656_p4 = pnand %p2655_p3, %p2649_p0 }
   0xb   :  { %2659 = shalt.err (!%p2656_p4)
}
   0xc   :  { %s2707_s28 = smov 128   ;;  %s2708_s29 = smov 8  }
   0xd   :  { %38 = dma.hbm_to_vmem [thread:$0]  %s3242_s3, 3072, %s33_s26, [#allocation3], %s2707_s28, %s2707_s28, %s2708_s29  }
   0xe   :  { %s2709_s15 = smov [#allocation5]  }
   0xf   :  { %s50_s16 = sshll.u32 %s2709_s15, 4  ;;  %s51_s16 = int_to_ptr.vmem [resolvable:$true] %s50_s16 }
  0x10   :  { %s2668_s17 = scalar_lea.vmem %s51_s16, 6144  ;;  %p2673_p6 = scmp.lt.s32.totalorder %s51_s16, %s51_s16 }
  0x11   :  { %p2669_p5 = scmp.ne.s32.totalorder %s51_s16, %s2668_s17  ;;  %p2674_p7 = scmp.lt.s32.totalorder %s2668_s17, %s2668_s17 }
  0x13   :  { %p2675_p8 = por %p2674_p7, %p2673_p6 }
  0x15   :  { %p2676_p9 = pnand %p2675_p8, %p2669_p5 }
  0x17   :  { %2679 = shalt.err (!%p2676_p9)
}
  0x18   :  { %56 = dma.hbm_to_vmem [thread:$0]  %s3246_s7, 6144, %s51_s16, [#allocation6], %s2707_s28, %s2707_s28, %s2708_s29  }
  0x19   :  { %2700 = dma.done.wait [#allocation3], 3072  }
  0x1a   :  { %2701 = vsyncadd [#allocation3], 4294964224 }
  0x1b   :  { %2702 = dma.done.wait [#allocation6], 6144  }
  0x1c   :  { %2703 = vsyncadd [#allocation6], 4294961152  ;;  %vm103_vm0 = vcmask 261120   ;;  %v2798_v0 = vld [vmem:[%s3239_s0 + $0x18] sm:$0xff]  ;;  %v2803_v1 = vld [vmem:[%s3239_s0 + $0x10] sm:$0xff]  ;;  %vm315_vm1 = vcmask 523264  }
  0x1d   :  { %2223 = vmatprep.subr.mxu1 %v2798_v0  ;;  %v2809_v2 = vld [vmem:[%s3240_s1] sm:$0xff]  ;;  %v2815_v3 = vld [vmem:[%s3239_s0 + $0x8] sm:$0xff]  ;;  %v314_v5 = vld [vmem:[#allocation2 + $0x78] sm:$0xff]  ;;  %v2710_v44 = vmov 0.0   ;;  %vm2711_vm2 = vmmov 0   ;;  %vm712_vm3 = vcmask 64512  }
  0x1e   :  { %2224 = vmatpush3.msra.mxu1 %v2798_v0  ;;  %v98_v4 = vld [vmem:[%s3239_s0] sm:$0xff]  ;;  %2231 = vmatprep.mubr.msk.f32.mxu1 %vm103_vm0, %v2809_v2  ;;  %v313_v6 = vld [vmem:[#allocation2 + $0x70] sm:$0xff]  ;;  %v2830_v7 = vld [vmem:[%s3240_s1 + $0x8] sm:$0xff] }
  0x1f   :  { %2225 = vmatprep.subr.mxu1 %v2803_v1  ;;  %2267 = vmatprep.mubr.msk.f32.mxu0 %vm315_vm1, %v98_v4  ;;  %v2835_v8 = vld [vmem:[%s3240_s1 + $0x10] sm:$0xff]  ;;  %v312_v9 = vld [vmem:[#allocation2 + $0x68] sm:$0xff]  ;;  %v2846_v10 = vld [vmem:[%s3240_s1 + $0x18] sm:$0xff] }
  0x20   :  { %2226 = vmatpush3.msra.mxu1 %v2803_v1  ;;  %2251 = vmatprep.subr.mxu0 %v314_v5  ;;  %v2852_v11 = vld [vmem:[%s3241_s2] sm:$0xff]  ;;  %v2864_v13 = vld [vmem:[%s3241_s2 + $0x8] sm:$0xff]  ;;  %v310_v14 = vld [vmem:[#allocation2 + $0x58] sm:$0xff] }
  0x21   :  { %2227 = vmatprep.subr.mxu1 %v2815_v3  ;;  %2252 = vmatpush3.msra.mxu0 %v314_v5  ;;  %v311_v12 = vld [vmem:[#allocation2 + $0x60] sm:$0xff]  ;;  %v2869_v15 = vld [vmem:[%s3241_s2 + $0x10] sm:$0xff]  ;;  %v305_v16 = vld [vmem:[#allocation2 + $0x38] sm:$0xff] }
  0x22   :  { %2228 = vmatpush3.msra.mxu1 %v2815_v3  ;;  %2253 = vmatprep.subr.mxu0 %v313_v6  ;;  %v309_v17 = vld [vmem:[#allocation2 + $0x50] sm:$0xff]  ;;  %v2878_v18 = vld [vmem:[%s3241_s2 + $0x18] sm:$0xff]  ;;  %v308_v20 = vld [vmem:[#allocation2 + $0x48] sm:$0xff] }
  0x23   :  { %2229 = vmatprep.subr.mxu1 %v98_v4  ;;  %2254 = vmatpush3.msra.mxu0 %v313_v6  ;;  %v304_v19 = vld [vmem:[#allocation2 + $0x30] sm:$0xff]  ;;  %v303_v21 = vld [vmem:[#allocation2 + $0x28] sm:$0xff]  ;;  %v307_v22 = vld [vmem:[#allocation2 + $0x40] sm:$0xff] }
  0x24   :  { %2230 = vmatpush3.msra.mxu1 %v98_v4  ;;  %2255 = vmatprep.subr.mxu0 %v312_v9  ;;  %v302_v23 = vld [vmem:[#allocation2 + $0x20] sm:$0xff]  ;;  %v301_v24 = vld [vmem:[#allocation2 + $0x18] sm:$0xff]  ;;  %v300_v26 = vld [vmem:[#allocation2 + $0x10] sm:$0xff] }
  0x25   :  { %2232 = vmatmul.mubr.msk.f32.vlgmr.msra.gmra.mxu1 %vm103_vm0, %v2830_v7  ;;  %2237 = vmatprep.subr.mxu1 %v2798_v0  ;;  %v518_v25 = vld [vmem:[#allocation2 + $0xb8] sm:$0xff]  ;;  %v517_v27 = vld [vmem:[#allocation2 + $0xb0] sm:$0xff]  ;;  %v299_v28 = vld [vmem:[#allocation2 + $0x8] sm:$0xff] }
  0x26   :  { %2238 = vmatpush3.msra.mxu1 %v2798_v0  ;;  %2234 = vmatprep.mubr.msk.f32.mxu1 %vm103_vm0, %v2835_v8  ;;  %v516_v29 = vld [vmem:[#allocation2 + $0xa8] sm:$0xff]  ;;  %v298_v30 = vld [vmem:[#allocation2] sm:$0xff]  ;;  %v514_v32 = vld [vmem:[#allocation2 + $0x98] sm:$0xff] }
  0x27   :  { %2239 = vmatprep.subr.mxu1 %v2803_v1  ;;  %2256 = vmatpush3.msra.mxu0 %v312_v9  ;;  %v515_v31 = vld [vmem:[#allocation2 + $0xa0] sm:$0xff]  ;;  %v513_v33 = vld [vmem:[#allocation2 + $0x90] sm:$0xff]  ;;  %v512_v34 = vld [vmem:[#allocation2 + $0x88] sm:$0xff] }
  0x28   :  { %2240 = vmatpush3.msra.mxu1 %v2803_v1  ;;  %2257 = vmatprep.subr.mxu0 %v311_v12  ;;  %v511_v35 = vld [vmem:[#allocation2 + $0x80] sm:$0xff]  ;;  %v2900_v45 = vld [vmem:[%s3250_s11 + $0x78] sm:$0xff]  ;;  %v2908_v46 = vld [vmem:[%s3250_s11 + $0x70] sm:$0xff] }
  0x29   :  { %2235 = vmatmul.mubr.msk.f32.gmra.mxu1 %vm103_vm0, %v2846_v10  ;;  %2241 = vmatprep.subr.mxu1 %v2815_v3  ;;  %v2915_v47 = vld [vmem:[%s3250_s11 + $0x68] sm:$0xff]  ;;  %v2922_v48 = vld [vmem:[%s3250_s11 + $0x60] sm:$0xff]  ;;  %v2929_v49 = vld [vmem:[%s3250_s11 + $0x58] sm:$0xff] }
  0x2a   :  { %2242 = vmatpush3.msra.mxu1 %v2815_v3  ;;  %2245 = vmatprep.mubr.msk.f32.mxu1 %vm103_vm0, %v2852_v11  ;;  %v2936_v50 = vld [vmem:[%s3250_s11 + $0x50] sm:$0xff]  ;;  %v2943_v51 = vld [vmem:[%s3250_s11 + $0x48] sm:$0xff]  ;;  %v2950_v52 = vld [vmem:[%s3250_s11 + $0x40] sm:$0xff] }
  0x2b   :  { %2243 = vmatprep.subr.mxu1 %v98_v4  ;;  %2258 = vmatpush3.msra.mxu0 %v311_v12  ;;  %v2957_v53 = vld [vmem:[%s3250_s11 + $0x38] sm:$0xff]  ;;  %v2964_v54 = vld [vmem:[%s3250_s11 + $0x30] sm:$0xff]  ;;  %v2971_v55 = vld [vmem:[%s3250_s11 + $0x28] sm:$0xff] }
  0x2c   :  { %2244 = vmatpush3.msra.mxu1 %v98_v4  ;;  %2259 = vmatprep.subr.mxu0 %v310_v14  ;;  %v2978_v56 = vld [vmem:[%s3250_s11 + $0x20] sm:$0xff]  ;;  %v2985_v57 = vld [vmem:[%s3250_s11 + $0x18] sm:$0xff]  ;;  %v2992_v58 = vld [vmem:[%s3250_s11 + $0x10] sm:$0xff] }
  0x2d   :  { %2246 = vmatmul.mubr.msk.f32.vlgmr.msra.gmra.mxu1 %vm103_vm0, %v2864_v13  ;;  %2260 = vmatpush3.msra.mxu0 %v310_v14  ;;  %v2997_v59 = vld [vmem:[%s3250_s11 + $0x8] sm:$0xff]  ;;  %v3006_v60 = vld [vmem:[%s3250_s11] sm:$0xff] }
  0x2e   :  { %2248 = vmatprep.mubr.msk.f32.mxu1 %vm103_vm0, %v2869_v15  ;;  %2273 = vmatprep.subr.mxu1 %v305_v16  ;;  %v3016_v61 = vld [vmem:[%s3251_s12] sm:$0xff] }
  0x2f   :  { %2261 = vmatprep.subr.mxu0 %v309_v17  ;;  %2274 = vmatpush3.msra.mxu1 %v305_v16 }
  0x30   :  { %2262 = vmatpush3.msra.mxu0 %v309_v17  ;;  %2275 = vmatprep.subr.mxu1 %v304_v19 }
  0x31   :  { %2249 = vmatmul.mubr.msk.f32.gmra.mxu1 %vm103_vm0, %v2878_v18  ;;  %2263 = vmatprep.subr.mxu0 %v308_v20 }
  0x32   :  { %2276 = vmatpush3.msra.mxu1 %v304_v19  ;;  %2264 = vmatpush3.msra.mxu0 %v308_v20  ;;  %v1999_v20 = vld [vmem:[%s3243_s4] ss:$0 sm:$0xff] }
  0x33   :  { %2277 = vmatprep.subr.mxu1 %v303_v21  ;;  %2265 = vmatprep.subr.mxu0 %v307_v22 }
  0x34   :  { %2278 = vmatpush3.msra.mxu1 %v303_v21  ;;  %2266 = vmatpush3.msra.mxu0 %v307_v22 }
  0x35   :  { %2279 = vmatprep.subr.mxu1 %v302_v23  ;;  %2268 = vmatmul.mubr.msk.f32.vlgmr.msra.gmra.mxu0 %vm315_vm1, %v2815_v3 }
  0x36   :  { %2280 = vmatpush3.msra.mxu1 %v302_v23  ;;  %2295 = vmatprep.subr.mxu0 %v518_v25 }
  0x37   :  { %2281 = vmatprep.subr.mxu1 %v301_v24  ;;  %2296 = vmatpush3.msra.mxu0 %v518_v25 }
  0x38   :  { %2282 = vmatpush3.msra.mxu1 %v301_v24  ;;  %2297 = vmatprep.subr.mxu0 %v517_v27 }
  0x39   :  { %2283 = vmatprep.subr.mxu1 %v300_v26  ;;  %2298 = vmatpush3.msra.mxu0 %v517_v27 }
  0x3a   :  { %2284 = vmatpush3.msra.mxu1 %v300_v26  ;;  %2270 = vmatprep.mubr.msk.f32.mxu0 %vm315_vm1, %v2803_v1 }
  0x3b   :  { %2271 = vmatmul.mubr.msk.f32.gmra.mxu0 %vm315_vm1, %v2798_v0  ;;  %2285 = vmatprep.subr.mxu1 %v299_v28 }
  0x3c   :  { %2299 = vmatprep.subr.mxu0 %v516_v29  ;;  %2286 = vmatpush3.msra.mxu1 %v299_v28 }
  0x3d   :  { %2300 = vmatpush3.msra.mxu0 %v516_v29  ;;  %2287 = vmatprep.subr.mxu1 %v298_v30 }
  0x3e   :  { %2301 = vmatprep.subr.mxu0 %v515_v31  ;;  %2288 = vmatpush3.msra.mxu1 %v298_v30 }
  0x3f   :  { %2302 = vmatpush3.msra.mxu0 %v515_v31  ;;  %2317 = vmatprep.subr.mxu1 %v2710_v44 }
  0x40   :  { %2303 = vmatprep.subr.mxu0 %v514_v32 }
  0x41   :  { %2304 = vmatpush3.msra.mxu0 %v514_v32 }
  0x42   :  { %2305 = vmatprep.subr.mxu0 %v513_v33 }
  0x43   :  { %2306 = vmatpush3.msra.mxu0 %v513_v33 }
  0x44   :  { %2307 = vmatprep.subr.mxu0 %v512_v34 }
  0x45   :  { %2308 = vmatpush3.msra.mxu0 %v512_v34 }
  0x46   :  { %2309 = vmatprep.subr.mxu0 %v511_v35 }
  0x47   :  { %2310 = vmatpush3.msra.mxu0 %v511_v35 }
  0x48   :  { %2352 = vmatprep.subr.mxu0 %v2710_v44 }
  0xe5   :  { %v2233_v36 = vpop.f32.mrf.mxu1 }
  0xe7   :  { %v182_v37 = vpop.f32.mrf.mxu1 }
  0xe8   :  { %2289 = vmatprep.mubr.msk.f32.mxu1 %vm315_vm1, %v182_v37 }
  0xe9   :  { %v2236_v38 = vpop.f32.mrf.mxu1  ;;  %2290 = vmatmul.mubr.msk.f32.vlgmr.msra.gmra.mxu1 %vm315_vm1, %v2233_v36 }
  0xea   :  { %2318 = vmatpush3.msra.mxu1 %v2900_v45 }
  0xeb   :  { %v192_v39 = vpop.f32.mrf.mxu1  ;;  %2319 = vmatprep.subr.mxu1 %v2710_v44 }
  0xec   :  { %2292 = vmatprep.mubr.msk.f32.mxu1 %vm315_vm1, %v192_v39  ;;  %2320 = vmatpush3.msra.mxu1 %v2908_v46 }
  0xed   :  { %v2247_v40 = vpop.f32.mrf.mxu1  ;;  %2293 = vmatmul.mubr.msk.f32.gmra.mxu1 %vm315_vm1, %v2236_v38  ;;  %2321 = vmatprep.subr.mxu1 %v2710_v44 }
  0xee   :  { %2322 = vmatpush3.msra.mxu1 %v2915_v47  ;;  %2349 = vmatprep.mubr.msk.f32.mxu1 %vm2711_vm2, %v2710_v44 }
  0xef   :  { %v279_v41 = vpop.f32.mrf.mxu1  ;;  %2323 = vmatprep.subr.mxu1 %v2710_v44 }
  0xf0   :  { %2311 = vmatprep.mubr.msk.f32.mxu0 %vm315_vm1, %v279_v41  ;;  %2324 = vmatpush3.msra.mxu1 %v2922_v48 }
  0xf1   :  { %v2250_v42 = vpop.f32.mrf.mxu1  ;;  %2312 = vmatmul.mubr.msk.f32.vlgmr.msra.gmra.mxu0 %vm315_vm1, %v2247_v40  ;;  %2325 = vmatprep.subr.mxu1 %v2710_v44 }
  0xf2   :  { %2326 = vmatpush3.msra.mxu1 %v2929_v49  ;;  %2353 = vmatpush3.msra.mxu0 %v3016_v61 }
  0xf3   :  { %v289_v43 = vpop.f32.mrf.mxu1  ;;  %2327 = vmatprep.subr.mxu1 %v2710_v44  ;;  %2357 = vmatprep.subr.mxu0 %v2710_v44 }
  0xf4   :  { %2314 = vmatprep.mubr.msk.f32.mxu0 %vm315_vm1, %v289_v43  ;;  %2328 = vmatpush3.msra.mxu1 %v2936_v50  ;;  %v786_v43 = vlaneseq }
  0xf5   :  { %2315 = vmatmul.mubr.msk.f32.gmra.mxu0 %vm315_vm1, %v2250_v42  ;;  %2329 = vmatprep.subr.mxu1 %v2710_v44  ;;  %v2269_v62 = vpop.f32.mrf.mxu0 }
  0xf6   :  { %2330 = vmatpush3.msra.mxu1 %v2943_v51  ;;  %2354 = vmatprep.mubr.msk.f32.mxu0 %vm2711_vm2, %v2710_v44 }
  0xf7   :  { %2331 = vmatprep.subr.mxu1 %v2710_v44  ;;  %v394_v63 = vpop.f32.mrf.mxu0 }
  0xf8   :  { %2332 = vmatpush3.msra.mxu1 %v2950_v52 }
  0xf9   :  { %2333 = vmatprep.subr.mxu1 %v2710_v44 }
  0xfa   :  { %2334 = vmatpush3.msra.mxu1 %v2957_v53 }
  0xfb   :  { %2335 = vmatprep.subr.mxu1 %v2710_v44  ;;  %v2272_v1 = vpop.f32.mrf.mxu0 }
  0xfc   :  { %2336 = vmatpush3.msra.mxu1 %v2964_v54 }
  0xfd   :  { %2337 = vmatprep.subr.mxu1 %v2710_v44  ;;  %v404_v4 = vpop.f32.mrf.mxu0 }
  0xfe   :  { %2338 = vmatpush3.msra.mxu1 %v2971_v55 }
  0xff   :  { %2339 = vmatprep.subr.mxu1 %v2710_v44 }
 0x100   :  { %2340 = vmatpush3.msra.mxu1 %v2978_v56 }
 0x101   :  { %2341 = vmatprep.subr.mxu1 %v2710_v44 }
 0x102   :  { %2342 = vmatpush3.msra.mxu1 %v2985_v57 }
 0x103   :  { %2343 = vmatprep.subr.mxu1 %v2710_v44 }
 0x104   :  { %2344 = vmatpush3.msra.mxu1 %v2992_v58 }
 0x105   :  { %2345 = vmatprep.subr.mxu1 %v2710_v44 }
 0x106   :  { %2346 = vmatpush3.msra.mxu1 %v2997_v59 }
 0x107   :  { %2347 = vmatprep.subr.mxu1 %v2710_v44 }
 0x108   :  { %2348 = vmatpush3.msra.mxu1 %v3006_v60 }
 0x109   :  { %2392 = vmatprep.subr.mxu1 %v2710_v44 }
 0x1a9   :  { %v2291_v0 = vpop.f32.mrf.mxu1 }
 0x1aa   :  { %v497_v9 = vadd.f32 %v2291_v0, %v2269_v62  ;;  %v787_v62 = vshrl.u32 %v786_v43, 7 }
 0x1ab   :  { %v491_v3 = vpop.f32.mrf.mxu1 }
 0x1ac   :  { %v492_v12 = vadd.f32 %v491_v3, %v394_v63  ;;  %v3077_v63 = vsub.s32 0, %v787_v62 }
 0x1ad   :  { %v2294_v5 = vpop.f32.mrf.mxu1 }
 0x1ae   :  { %v507_v22 = vadd.f32 %v2294_v5, %v2272_v1 }
 0x1af   :  { %v501_v14 = vpop.f32.mrf.mxu1 }
 0x1b0   :  { %v502_v23 = vadd.f32 %v501_v14, %v404_v4 }
 0x1b1   :  { %v2313_v6 = vpop.f32.mrf.mxu0 }
 0x1b2   :  { %v617_v17 = vadd.f32 %v2313_v6, %v497_v9 }
 0x1b3   :  { %v597_v16 = vpop.f32.mrf.mxu0 }
 0x1b4   :  { %v616_v19 = vadd.f32 %v597_v16, %v492_v12  ;;  %v3026_v26 = vadd.f32 %v1999_v20, %v617_v17 }
 0x1b5   :  { %v2316_v21 = vpop.f32.mrf.mxu0 }
 0x1b6   :  { %v3024_v24 = vadd.f32 %v1999_v20, %v616_v19  ;;  %v619_v27 = vadd.f32 %v2316_v21, %v507_v22 }
 0x1b7   :  { %v607_v25 = vpop.f32.mrf.mxu0 }
 0x1b8   :  { %v618_v28 = vadd.f32 %v607_v25, %v502_v23  ;;  %v632_v29 = vadd.f32 %v3026_v26, %v3024_v24  ;;  %v3032_v31 = vadd.f32 %v1999_v20, %v619_v27 }
 0x1ba   :  { %v3030_v30 = vadd.f32 %v1999_v20, %v618_v28 }
 0x1bc   :  { %v633_v32 = vadd.f32 %v632_v29, %v3030_v30 }
 0x1be   :  { %v634_v33 = vadd.f32 %v633_v32, %v3032_v31  ;;  %v1252_v32 = vld [vmem:[#allocation5 + $0xf8] sm:$0xff] }
 0x1c0   :  { %v635_v34 = vrot.slane %v634_v33, 4 }
 0x1c2   :  { %v636_v35 = vadd.f32 %v635_v34, %v634_v33  ;;  %v1251_v33 = vld [vmem:[#allocation5 + $0xf0] sm:$0xff]  ;;  %v1250_v34 = vld [vmem:[#allocation5 + $0xe8] sm:$0xff] }
 0x1c4   :  { %v637_v36 = vrot.slane %v636_v35, 2 }
 0x1c6   :  { %v638_v37 = vadd.f32 %v637_v36, %v636_v35  ;;  %v1249_v35 = vld [vmem:[#allocation5 + $0xe0] sm:$0xff]  ;;  %v1248_v36 = vld [vmem:[#allocation5 + $0xd8] sm:$0xff] }
 0x1c8   :  { %v639_v38 = vrot.slane %v638_v37, 1 }
 0x1ca   :  { %v640_v39 = vadd.f32 %v639_v38, %v638_v37  ;;  %v1247_v37 = vld [vmem:[#allocation5 + $0xd0] sm:$0xff]  ;;  %v1246_v38 = vld [vmem:[#allocation5 + $0xc8] sm:$0xff] }
 0x1cc   :  { %2350 = vmatmul.mubr.f32.vlgmr.msra.gmra.mxu1 %v640_v39  ;;  %v1245_v39 = vld [vmem:[#allocation5 + $0xc0] sm:$0xff] }
 0x1cd   :  { %2393 = vmatpush3.msra.mxu1 %v3016_v61  ;;  %2394 = vmatprep.mubr.msk.f32.mxu1 %vm2711_vm2, %v2710_v44 }
 0x1ce   :  { %2397 = vmatprep.subr.mxu1 %v2710_v44 }
 0x28c   :  { %v707_v40 = vpop.f32.mrf.mxu1 }
 0x28d   :  { %v3040_v41 = vmul.f32 0.001953125, %v707_v40  ;;  %v1244_v40 = vld [vmem:[#allocation5 + $0xb8] sm:$0xff] }
 0x28e   :  { %v2351_v42 = vpop.f32.mrf.mxu1 }
 0x28f   :  { %2355 = vmatmul.mubr.msk.f32.vlgmr.msra.gmra.mxu0 %vm712_vm3, %v3040_v41  ;;  %v1243_v42 = vld [vmem:[#allocation5 + $0xb0] sm:$0xff] }
 0x290   :  { %2358 = vmatpush3.msra.mxu0 %v2900_v45  ;;  %2389 = vmatprep.mubr.msk.f32.mxu0 %vm2711_vm2, %v2710_v44 }
 0x291   :  { %2359 = vmatprep.subr.mxu0 %v2710_v44 }
 0x292   :  { %2360 = vmatpush3.msra.mxu0 %v2908_v46 }
 0x293   :  { %2361 = vmatprep.subr.mxu0 %v2710_v44 }
 0x294   :  { %2362 = vmatpush3.msra.mxu0 %v2915_v47 }
 0x295   :  { %2363 = vmatprep.subr.mxu0 %v2710_v44 }
 0x296   :  { %2364 = vmatpush3.msra.mxu0 %v2922_v48 }
 0x297   :  { %2365 = vmatprep.subr.mxu0 %v2710_v44 }
 0x298   :  { %2366 = vmatpush3.msra.mxu0 %v2929_v49 }
 0x299   :  { %2367 = vmatprep.subr.mxu0 %v2710_v44 }
 0x29a   :  { %2368 = vmatpush3.msra.mxu0 %v2936_v50 }
 0x29b   :  { %2369 = vmatprep.subr.mxu0 %v2710_v44 }
 0x29c   :  { %2370 = vmatpush3.msra.mxu0 %v2943_v51 }
 0x29d   :  { %2371 = vmatprep.subr.mxu0 %v2710_v44 }
 0x29e   :  { %2372 = vmatpush3.msra.mxu0 %v2950_v52 }
 0x29f   :  { %2373 = vmatprep.subr.mxu0 %v2710_v44 }
 0x2a0   :  { %2374 = vmatpush3.msra.mxu0 %v2957_v53 }
 0x2a1   :  { %2375 = vmatprep.subr.mxu0 %v2710_v44 }
 0x2a2   :  { %2376 = vmatpush3.msra.mxu0 %v2964_v54 }
 0x2a3   :  { %2377 = vmatprep.subr.mxu0 %v2710_v44 }
 0x2a4   :  { %2378 = vmatpush3.msra.mxu0 %v2971_v55 }
 0x2a5   :  { %2379 = vmatprep.subr.mxu0 %v2710_v44 }
 0x2a6   :  { %2380 = vmatpush3.msra.mxu0 %v2978_v56 }
 0x2a7   :  { %2381 = vmatprep.subr.mxu0 %v2710_v44 }
 0x2a8   :  { %2382 = vmatpush3.msra.mxu0 %v2985_v57 }
 0x2a9   :  { %2383 = vmatprep.subr.mxu0 %v2710_v44 }
 0x2aa   :  { %2384 = vmatpush3.msra.mxu0 %v2992_v58 }
 0x2ab   :  { %2385 = vmatprep.subr.mxu0 %v2710_v44 }
 0x2ac   :  { %2386 = vmatpush3.msra.mxu0 %v2997_v59 }
 0x2ad   :  { %2387 = vmatprep.subr.mxu0 %v2710_v44 }
 0x2ae   :  { %2388 = vmatpush3.msra.mxu0 %v3006_v60 }
 0x2af   :  { %2430 = vmatprep.subr.mxu0 %v1252_v32 }
 0x34f   :  { %v782_v0 = vpop.f32.mrf.mxu0 }
 0x350   :  { %v789_v1 = vrot.slane %v782_v0, %v3077_v63 }
 0x351   :  { %v2356_v3 = vpop.f32.mrf.mxu0 }
 0x352   :  { %v790_v4 = vsub.f32 %v3024_v24, %v789_v1  ;;  %v791_v5 = vsub.f32 %v3026_v26, %v789_v1  ;;  %v792_v6 = vsub.f32 %v3030_v30, %v789_v1  ;;  %v793_v9 = vsub.f32 %v3032_v31, %v789_v1  ;;  %v630_v3 = vld [vmem:[%s3244_s5] sm:$0x1] }
 0x354   :  { %v794_v12 = vmul.f32 %v790_v4, %v790_v4  ;;  %v795_v14 = vmul.f32 %v791_v5, %v791_v5  ;;  %v796_v16 = vmul.f32 %v792_v6, %v792_v6  ;;  %v797_v19 = vmul.f32 %v793_v9, %v793_v9  ;;  %v631_v6 = vld [vmem:[%s3245_s6] sm:$0x1] }
 0x356   :  { %v798_v17 = vadd.f32 %v795_v14, %v794_v12  ;;  %v1242_v14 = vld [vmem:[#allocation5 + $0xa8] sm:$0xff] }
 0x358   :  { %v799_v20 = vadd.f32 %v798_v17, %v796_v16  ;;  %v1241_v16 = vld [vmem:[#allocation5 + $0xa0] sm:$0xff]  ;;  %v1240_v17 = vld [vmem:[#allocation5 + $0x98] sm:$0xff] }
 0x35a   :  { %v800_v21 = vadd.f32 %v799_v20, %v797_v19  ;;  %v1238_v19 = vld [vmem:[#allocation5 + $0x88] sm:$0xff]  ;;  %v1237_v20 = vld [vmem:[#allocation5 + $0x80] sm:$0xff] }
 0x35c   :  { %v801_v22 = vrot.slane %v800_v21, 4 }
 0x35e   :  { %v802_v23 = vadd.f32 %v801_v22, %v800_v21  ;;  %v1439_v21 = vld [vmem:[#allocation5 + $0x178] sm:$0xff] }
 0x360   :  { %v803_v25 = vrot.slane %v802_v23, 2 }
 0x362   :  { %v804_v27 = vadd.f32 %v803_v25, %v802_v23 }
 0x364   :  { %v805_v28 = vrot.slane %v804_v27, 1 }
 0x366   :  { %v806_v29 = vadd.f32 %v805_v28, %v804_v27 }
 0x368   :  { %2390 = vmatmul.mubr.f32.vlgmr.msra.gmra.mxu0 %v806_v29 }
 0x369   :  { %2431 = vmatpush3.msra.mxu0 %v1252_v32 }
 0x36a   :  { %2432 = vmatprep.subr.mxu0 %v1251_v33 }
 0x36b   :  { %2433 = vmatpush3.msra.mxu0 %v1251_v33 }
 0x36c   :  { %2434 = vmatprep.subr.mxu0 %v1250_v34 }
 0x36d   :  { %2435 = vmatpush3.msra.mxu0 %v1250_v34 }
 0x36e   :  { %2436 = vmatprep.subr.mxu0 %v1249_v35 }
 0x36f   :  { %2437 = vmatpush3.msra.mxu0 %v1249_v35 }
 0x370   :  { %2438 = vmatprep.subr.mxu0 %v1248_v36 }
 0x371   :  { %2439 = vmatpush3.msra.mxu0 %v1248_v36 }
 0x372   :  { %2440 = vmatprep.subr.mxu0 %v1247_v37 }
 0x373   :  { %2441 = vmatpush3.msra.mxu0 %v1247_v37 }
 0x374   :  { %2442 = vmatprep.subr.mxu0 %v1246_v38 }
 0x375   :  { %2443 = vmatpush3.msra.mxu0 %v1246_v38 }
 0x376   :  { %2444 = vmatprep.subr.mxu0 %v1245_v39 }
 0x377   :  { %2445 = vmatpush3.msra.mxu0 %v1245_v39 }
 0x378   :  { %2446 = vmatprep.subr.mxu0 %v1244_v40 }
 0x379   :  { %2447 = vmatpush3.msra.mxu0 %v1244_v40 }
 0x37a   :  { %2448 = vmatprep.subr.mxu0 %v1243_v42 }
 0x37b   :  { %2449 = vmatpush3.msra.mxu0 %v1243_v42 }
 0x37c   :  { %2450 = vmatprep.subr.mxu0 %v1242_v14 }
 0x37d   :  { %2451 = vmatpush3.msra.mxu0 %v1242_v14  ;;  %v1431_v14 = vld [vmem:[#allocation5 + $0x138] sm:$0xff] }
 0x37e   :  { %2452 = vmatprep.subr.mxu0 %v1241_v16 }
 0x37f   :  { %2453 = vmatpush3.msra.mxu0 %v1241_v16  ;;  %v1222_v16 = vld [vmem:[#allocation5 + $0x10] sm:$0xff] }
 0x380   :  { %2454 = vmatprep.subr.mxu0 %v1240_v17 }
 0x381   :  { %2455 = vmatpush3.msra.mxu0 %v1240_v17  ;;  %v1430_v17 = vld [vmem:[#allocation5 + $0x130] sm:$0xff] }
 0x428   :  { %v873_v43 = vpop.f32.mrf.mxu0 }
 0x429   :  { %v877_v62 = vmul.f32 0.001953125, %v873_v43 }
 0x42a   :  { %v2391_v0 = vpop.f32.mrf.mxu0 }
 0x42b   :  { %v878_v1 = vadd.f32 1e-05, %v877_v62  ;;  %v1234_v62 = vld [vmem:[#allocation5 + $0x70] sm:$0xff]  ;;  %v1433_v0 = vld [vmem:[#allocation5 + $0x148] sm:$0xff] }
 0x42d   :  { %2636 = vrsqrt.f32 %v878_v1  ;;  %v1231_v1 = vld [vmem:[#allocation5 + $0x58] sm:$0xff] }
 0x43a   :  { %v2637_v4 = vpop.eup %2636 }
 0x43b   :  { %v880_v5 = vmul.f32 %v2637_v4, %v630_v3  ;;  %v1228_v3 = vld [vmem:[#allocation5 + $0x40] sm:$0xff]  ;;  %v1227_v4 = vld [vmem:[#allocation5 + $0x38] sm:$0xff] }
 0x43d   :  { %2395 = vmatmul.mubr.msk.f32.vlgmr.msra.gmra.mxu1 %vm712_vm3, %v880_v5  ;;  %v881_v9 = vmul.f32 %v880_v5, %v3040_v41  ;;  %v1239_v41 = vld [vmem:[#allocation5 + $0x90] sm:$0xff]  ;;  %v1225_v5 = vld [vmem:[#allocation5 + $0x28] sm:$0xff] }
 0x43e   :  { %2398 = vmatpush3.msra.mxu1 %v3016_v61  ;;  %2399 = vmatprep.mubr.msk.f32.mxu1 %vm2711_vm2, %v2710_v44 }
 0x43f   :  { %v882_v12 = vsub.f32 %v631_v6, %v881_v9  ;;  %2456 = vmatprep.subr.mxu0 %v1239_v41  ;;  %v1224_v6 = vld [vmem:[#allocation5 + $0x20] sm:$0xff] }
 0x440   :  { %2457 = vmatpush3.msra.mxu0 %v1239_v41  ;;  %v1432_v9 = vld [vmem:[#allocation5 + $0x140] sm:$0xff]  ;;  %v1221_v41 = vld [vmem:[#allocation5 + $0x8] sm:$0xff] }
 0x441   :  { %2400 = vmatmul.mubr.msk.f32.vlgmr.msra.gmra.mxu1 %vm712_vm3, %v882_v12  ;;  %2458 = vmatprep.subr.mxu0 %v1238_v19  ;;  %v1223_v12 = vld [vmem:[#allocation5 + $0x18] sm:$0xff] }
 0x442   :  { %2410 = vmatprep.mubr.msk.f32.mxu1 %vm103_vm0, %v2809_v2  ;;  %2459 = vmatpush3.msra.mxu0 %v1238_v19  ;;  %v1429_v19 = vld [vmem:[#allocation5 + $0x128] sm:$0xff] }
 0x443   :  { %2460 = vmatprep.subr.mxu0 %v1237_v20 }
 0x444   :  { %2461 = vmatpush3.msra.mxu0 %v1237_v20  ;;  %v1220_v20 = vld [vmem:[#allocation5] sm:$0xff] }
 0x445   :  { %2506 = vmatprep.subr.mxu0 %v1439_v21 }
 0x4fd   :  { %v952_v2 = vpop.f32.mrf.mxu1 }
 0x4fe   :  { %v1032_v22 = vrot.slane %v952_v2, %v3077_v63  ;;  %v1427_v2 = vld [vmem:[#allocation5 + $0x118] sm:$0xff] }
 0x4ff   :  { %v2396_v23 = vpop.f32.mrf.mxu1 }
 0x500   :  { %v1033_v25 = vmul.f32 %v1032_v22, %v3024_v24  ;;  %v1034_v28 = vmul.f32 %v1032_v22, %v3026_v26  ;;  %v1035_v29 = vmul.f32 %v1032_v22, %v3030_v30  ;;  %v1036_v32 = vmul.f32 %v1032_v22, %v3032_v31  ;;  %v1438_v24 = vld [vmem:[#allocation5 + $0x170] sm:$0xff]  ;;  %v1437_v26 = vld [vmem:[#allocation5 + $0x168] sm:$0xff]  ;;  %v1436_v30 = vld [vmem:[#allocation5 + $0x160] sm:$0xff] }
 0x501   :  { %v1025_v27 = vpop.f32.mrf.mxu1  ;;  %v1435_v31 = vld [vmem:[#allocation5 + $0x158] sm:$0xff]  ;;  %v1426_v22 = vld [vmem:[#allocation5 + $0x110] sm:$0xff]  ;;  %v1425_v23 = vld [vmem:[#allocation5 + $0x108] sm:$0xff] }
 0x502   :  { %v1040_v33 = vrot.slane %v1025_v27, %v3077_v63 }
 0x503   :  { %v2401_v34 = vpop.f32.mrf.mxu1 }
 0x504   :  { %v1041_v35 = vadd.f32 %v1040_v33, %v1033_v25  ;;  %v1042_v36 = vadd.f32 %v1040_v33, %v1034_v28  ;;  %v1043_v37 = vadd.f32 %v1040_v33, %v1035_v29  ;;  %v1044_v38 = vadd.f32 %v1040_v33, %v1036_v32  ;;  %v1424_v25 = vld [vmem:[#allocation5 + $0x100] sm:$0xff] }
 0x506   :  { %v1045_v39 = vmax.f32 %v1041_v35, 0.0  ;;  %v1046_v40 = vmax.f32 %v1042_v36, 0.0  ;;  %v1048_v42 = vmax.f32 %v1044_v38, 0.0  ;;  %v1047_v43 = vmax.f32 %v1043_v37, 0.0 }
 0x508   :  { %2402 = vmatprep.subr.mxu1 %v1048_v42  ;;  %2462 = vmatprep.mubr.f32.mxu0 %v1045_v39 }
 0x509   :  { %2403 = vmatpush3.msra.mxu1 %v1048_v42  ;;  %2463 = vmatmul.mubr.f32.vlgmr.msra.gmra.mxu0 %v1046_v40 }
 0x50a   :  { %2404 = vmatprep.subr.mxu1 %v1047_v43  ;;  %2465 = vmatprep.mubr.f32.mxu0 %v1047_v43 }
 0x50b   :  { %2405 = vmatpush3.msra.mxu1 %v1047_v43  ;;  %2507 = vmatpush3.msra.mxu0 %v1439_v21  ;;  %v1428_v21 = vld [vmem:[#allocation5 + $0x120] sm:$0xff] }
 0x50c   :  { %2406 = vmatprep.subr.mxu1 %v1046_v40  ;;  %2508 = vmatprep.subr.mxu0 %v1438_v24 }
 0x50d   :  { %2407 = vmatpush3.msra.mxu1 %v1046_v40  ;;  %2466 = vmatmul.mubr.f32.gmra.mxu0 %v1048_v42 }
 0x50e   :  { %2408 = vmatprep.subr.mxu1 %v1045_v39  ;;  %2509 = vmatpush3.msra.mxu0 %v1438_v24 }
 0x50f   :  { %2409 = vmatpush3.msra.mxu1 %v1045_v39  ;;  %2510 = vmatprep.subr.mxu0 %v1437_v26 }
 0x510   :  { %2411 = vmatmul.mubr.msk.f32.vlgmr.msra.gmra.mxu1 %vm103_vm0, %v2830_v7  ;;  %2416 = vmatprep.subr.mxu1 %v1048_v42  ;;  %v1235_v7 = vld [vmem:[#allocation5 + $0x78] sm:$0xff] }
 0x511   :  { %2417 = vmatpush3.msra.mxu1 %v1048_v42  ;;  %2413 = vmatprep.mubr.msk.f32.mxu1 %vm103_vm0, %v2835_v8  ;;  %v1434_v8 = vld [vmem:[#allocation5 + $0x150] sm:$0xff] }
 0x512   :  { %2418 = vmatprep.subr.mxu1 %v1047_v43  ;;  %2511 = vmatpush3.msra.mxu0 %v1437_v26 }
 0x513   :  { %2419 = vmatpush3.msra.mxu1 %v1047_v43  ;;  %2512 = vmatprep.subr.mxu0 %v1436_v30 }
 0x514   :  { %2414 = vmatmul.mubr.msk.f32.gmra.mxu1 %vm103_vm0, %v2846_v10  ;;  %2420 = vmatprep.subr.mxu1 %v1046_v40  ;;  %v1233_v10 = vld [vmem:[#allocation5 + $0x68] sm:$0xff] }
 0x515   :  { %2421 = vmatpush3.msra.mxu1 %v1046_v40  ;;  %2424 = vmatprep.mubr.msk.f32.mxu1 %vm103_vm0, %v2852_v11  ;;  %v1232_v11 = vld [vmem:[#allocation5 + $0x60] sm:$0xff] }
 0x516   :  { %2422 = vmatprep.subr.mxu1 %v1045_v39  ;;  %2513 = vmatpush3.msra.mxu0 %v1436_v30 }
 0x517   :  { %2423 = vmatpush3.msra.mxu1 %v1045_v39  ;;  %2514 = vmatprep.subr.mxu0 %v1435_v31 }
 0x518   :  { %2425 = vmatmul.mubr.msk.f32.vlgmr.msra.gmra.mxu1 %vm103_vm0, %v2864_v13  ;;  %2468 = vmatprep.subr.mxu1 %v1235_v7  ;;  %v1230_v13 = vld [vmem:[#allocation5 + $0x50] sm:$0xff] }
 0x519   :  { %2427 = vmatprep.mubr.msk.f32.mxu1 %vm103_vm0, %v2869_v15  ;;  %2469 = vmatpush3.msra.mxu1 %v1235_v7  ;;  %v1229_v15 = vld [vmem:[#allocation5 + $0x48] sm:$0xff] }
 0x51a   :  { %2470 = vmatprep.subr.mxu1 %v1234_v62  ;;  %2515 = vmatpush3.msra.mxu0 %v1435_v31 }
 0x51b   :  { %2471 = vmatpush3.msra.mxu1 %v1234_v62  ;;  %2516 = vmatprep.subr.mxu0 %v1434_v8 }
 0x51c   :  { %2428 = vmatmul.mubr.msk.f32.gmra.mxu1 %vm103_vm0, %v2878_v18  ;;  %2472 = vmatprep.subr.mxu1 %v1233_v10  ;;  %v1226_v18 = vld [vmem:[#allocation5 + $0x30] sm:$0xff] }
 0x51d   :  { %2473 = vmatpush3.msra.mxu1 %v1233_v10  ;;  %2517 = vmatpush3.msra.mxu0 %v1434_v8 }
 0x51e   :  { %2474 = vmatprep.subr.mxu1 %v1232_v11  ;;  %2518 = vmatprep.subr.mxu0 %v1433_v0 }
 0x51f   :  { %2475 = vmatpush3.msra.mxu1 %v1232_v11  ;;  %2519 = vmatpush3.msra.mxu0 %v1433_v0 }
 0x520   :  { %2476 = vmatprep.subr.mxu1 %v1231_v1  ;;  %2520 = vmatprep.subr.mxu0 %v1432_v9 }
 0x521   :  { %2477 = vmatpush3.msra.mxu1 %v1231_v1  ;;  %2521 = vmatpush3.msra.mxu0 %v1432_v9 }
 0x522   :  { %2478 = vmatprep.subr.mxu1 %v1230_v13  ;;  %2522 = vmatprep.subr.mxu0 %v1431_v14 }
 0x523   :  { %2479 = vmatpush3.msra.mxu1 %v1230_v13  ;;  %2523 = vmatpush3.msra.mxu0 %v1431_v14 }
 0x524   :  { %2480 = vmatprep.subr.mxu1 %v1229_v15  ;;  %2524 = vmatprep.subr.mxu0 %v1430_v17 }
 0x525   :  { %2481 = vmatpush3.msra.mxu1 %v1229_v15  ;;  %2525 = vmatpush3.msra.mxu0 %v1430_v17 }
 0x526   :  { %2482 = vmatprep.subr.mxu1 %v1228_v3  ;;  %2526 = vmatprep.subr.mxu0 %v1429_v19 }
 0x527   :  { %2483 = vmatpush3.msra.mxu1 %v1228_v3  ;;  %2527 = vmatpush3.msra.mxu0 %v1429_v19 }
 0x528   :  { %2484 = vmatprep.subr.mxu1 %v1227_v4  ;;  %2528 = vmatprep.subr.mxu0 %v1428_v21 }
 0x529   :  { %2485 = vmatpush3.msra.mxu1 %v1227_v4  ;;  %2529 = vmatpush3.msra.mxu0 %v1428_v21 }
 0x52a   :  { %2486 = vmatprep.subr.mxu1 %v1226_v18  ;;  %2530 = vmatprep.subr.mxu0 %v1427_v2 }
 0x52b   :  { %2487 = vmatpush3.msra.mxu1 %v1226_v18  ;;  %2531 = vmatpush3.msra.mxu0 %v1427_v2 }
 0x52c   :  { %2488 = vmatprep.subr.mxu1 %v1225_v5  ;;  %2532 = vmatprep.subr.mxu0 %v1426_v22 }
 0x52d   :  { %2489 = vmatpush3.msra.mxu1 %v1225_v5  ;;  %2533 = vmatpush3.msra.mxu0 %v1426_v22 }
 0x52e   :  { %2490 = vmatprep.subr.mxu1 %v1224_v6  ;;  %2534 = vmatprep.subr.mxu0 %v1425_v23 }
 0x52f   :  { %2491 = vmatpush3.msra.mxu1 %v1224_v6  ;;  %2535 = vmatpush3.msra.mxu0 %v1425_v23 }
 0x530   :  { %2492 = vmatprep.subr.mxu1 %v1223_v12  ;;  %2536 = vmatprep.subr.mxu0 %v1424_v25 }
 0x531   :  { %2493 = vmatpush3.msra.mxu1 %v1223_v12  ;;  %2537 = vmatpush3.msra.mxu0 %v1424_v25 }
 0x532   :  { %2494 = vmatprep.subr.mxu1 %v1222_v16  ;;  %2584 = vmatprep.subr.mxu0 %v2710_v44 }
 0x533   :  { %2495 = vmatpush3.msra.mxu1 %v1222_v16 }
 0x534   :  { %2496 = vmatprep.subr.mxu1 %v1221_v41 }
 0x535   :  { %2497 = vmatpush3.msra.mxu1 %v1221_v41 }
 0x536   :  { %2498 = vmatprep.subr.mxu1 %v1220_v20 }
 0x537   :  { %2499 = vmatpush3.msra.mxu1 %v1220_v20 }
 0x538   :  { %2544 = vmatprep.subr.mxu1 %v2710_v44 }
 0x5d0   :  { %v2412_v27 = vpop.f32.mrf.mxu1 }
 0x5d2   :  { %v1116_v28 = vpop.f32.mrf.mxu1 }
 0x5d3   :  { %2500 = vmatprep.mubr.f32.mxu1 %v1116_v28 }
 0x5d4   :  { %v2415_v29 = vpop.f32.mrf.mxu1  ;;  %2501 = vmatmul.mubr.f32.vlgmr.msra.gmra.mxu1 %v2412_v27 }
 0x5d5   :  { %2545 = vmatpush3.msra.mxu1 %v2900_v45 }
 0x5d6   :  { %v1126_v32 = vpop.f32.mrf.mxu1  ;;  %2546 = vmatprep.subr.mxu1 %v2710_v44 }
 0x5d7   :  { %2503 = vmatprep.mubr.f32.mxu1 %v1126_v32  ;;  %2547 = vmatpush3.msra.mxu1 %v2908_v46 }
 0x5d8   :  { %v2426_v33 = vpop.f32.mrf.mxu1  ;;  %2504 = vmatmul.mubr.f32.gmra.mxu1 %v2415_v29  ;;  %2548 = vmatprep.subr.mxu1 %v2710_v44 }
 0x5d9   :  { %2549 = vmatpush3.msra.mxu1 %v2915_v47  ;;  %2576 = vmatprep.mubr.msk.f32.mxu1 %vm2711_vm2, %v2710_v44 }
 0x5da   :  { %v1201_v34 = vpop.f32.mrf.mxu1  ;;  %2550 = vmatprep.subr.mxu1 %v2710_v44 }
 0x5db   :  { %2538 = vmatprep.mubr.f32.mxu0 %v1201_v34  ;;  %2551 = vmatpush3.msra.mxu1 %v2922_v48 }
 0x5dc   :  { %v2429_v35 = vpop.f32.mrf.mxu1  ;;  %2539 = vmatmul.mubr.f32.vlgmr.msra.gmra.mxu0 %v2426_v33  ;;  %2552 = vmatprep.subr.mxu1 %v2710_v44 }
 0x5dd   :  { %2553 = vmatpush3.msra.mxu1 %v2929_v49  ;;  %2585 = vmatpush3.msra.mxu0 %v2900_v45  ;;  %v2464_v45 = vpop.f32.mrf.mxu0 }
 0x5de   :  { %v1211_v36 = vpop.f32.mrf.mxu1  ;;  %2554 = vmatprep.subr.mxu1 %v2710_v44  ;;  %2586 = vmatprep.subr.mxu0 %v2710_v44 }
 0x5df   :  { %2541 = vmatprep.mubr.f32.mxu0 %v1211_v36  ;;  %2555 = vmatpush3.msra.mxu1 %v2936_v50 }
 0x5e0   :  { %2542 = vmatmul.mubr.f32.gmra.mxu0 %v2429_v35  ;;  %2556 = vmatprep.subr.mxu1 %v2710_v44 }
 0x5e1   :  { %2557 = vmatpush3.msra.mxu1 %v2943_v51  ;;  %2587 = vmatpush3.msra.mxu0 %v2908_v46  ;;  %v1319_v46 = vpop.f32.mrf.mxu0 }
 0x5e2   :  { %2558 = vmatprep.subr.mxu1 %v2710_v44  ;;  %2588 = vmatprep.subr.mxu0 %v2710_v44 }
 0x5e3   :  { %2559 = vmatpush3.msra.mxu1 %v2950_v52  ;;  %2589 = vmatpush3.msra.mxu0 %v2915_v47 }
 0x5e4   :  { %2560 = vmatprep.subr.mxu1 %v2710_v44  ;;  %2590 = vmatprep.subr.mxu0 %v2710_v44 }
 0x5e5   :  { %2561 = vmatpush3.msra.mxu1 %v2957_v53  ;;  %2591 = vmatpush3.msra.mxu0 %v2922_v48  ;;  %v2467_v48 = vpop.f32.mrf.mxu0 }
 0x5e6   :  { %2562 = vmatprep.subr.mxu1 %v2710_v44  ;;  %2592 = vmatprep.subr.mxu0 %v2710_v44 }
 0x5e7   :  { %2563 = vmatpush3.msra.mxu1 %v2964_v54  ;;  %2593 = vmatpush3.msra.mxu0 %v2929_v49 }
 0x5e8   :  { %2564 = vmatprep.subr.mxu1 %v2710_v44  ;;  %2594 = vmatprep.subr.mxu0 %v2710_v44 }
 0x5e9   :  { %2565 = vmatpush3.msra.mxu1 %v2971_v55  ;;  %2595 = vmatpush3.msra.mxu0 %v2936_v50  ;;  %v1329_v50 = vpop.f32.mrf.mxu0 }
 0x5ea   :  { %2566 = vmatprep.subr.mxu1 %v2710_v44  ;;  %2596 = vmatprep.subr.mxu0 %v2710_v44 }
 0x5eb   :  { %2567 = vmatpush3.msra.mxu1 %v2978_v56  ;;  %2597 = vmatpush3.msra.mxu0 %v2943_v51 }
 0x5ec   :  { %2568 = vmatprep.subr.mxu1 %v2710_v44  ;;  %2598 = vmatprep.subr.mxu0 %v2710_v44 }
 0x5ed   :  { %2569 = vmatpush3.msra.mxu1 %v2985_v57  ;;  %2599 = vmatpush3.msra.mxu0 %v2950_v52 }
 0x5ee   :  { %2570 = vmatprep.subr.mxu1 %v2710_v44  ;;  %2600 = vmatprep.subr.mxu0 %v2710_v44 }
 0x5ef   :  { %2571 = vmatpush3.msra.mxu1 %v2992_v58  ;;  %2601 = vmatpush3.msra.mxu0 %v2957_v53 }
 0x5f0   :  { %2572 = vmatprep.subr.mxu1 %v2710_v44  ;;  %2602 = vmatprep.subr.mxu0 %v2710_v44 }
 0x5f1   :  { %2573 = vmatpush3.msra.mxu1 %v2997_v59  ;;  %2603 = vmatpush3.msra.mxu0 %v2964_v54 }
 0x5f2   :  { %2574 = vmatprep.subr.mxu1 %v2710_v44  ;;  %2604 = vmatprep.subr.mxu0 %v2710_v44 }
 0x5f3   :  { %2575 = vmatpush3.msra.mxu1 %v3006_v60  ;;  %2605 = vmatpush3.msra.mxu0 %v2971_v55 }
 0x5f4   :  { %2579 = vmatprep.subr.mxu1 %v2710_v44  ;;  %2606 = vmatprep.subr.mxu0 %v2710_v44 }
 0x5f5   :  { %2607 = vmatpush3.msra.mxu0 %v2978_v56  ;;  %2616 = vmatprep.mubr.msk.f32.mxu0 %vm2711_vm2, %v2710_v44 }
 0x5f6   :  { %2608 = vmatprep.subr.mxu0 %v2710_v44 }
 0x5f7   :  { %2609 = vmatpush3.msra.mxu0 %v2985_v57 }
 0x5f8   :  { %2610 = vmatprep.subr.mxu0 %v2710_v44 }
 0x5f9   :  { %2611 = vmatpush3.msra.mxu0 %v2992_v58 }
 0x5fa   :  { %2612 = vmatprep.subr.mxu0 %v2710_v44 }
 0x5fb   :  { %2613 = vmatpush3.msra.mxu0 %v2997_v59  ;;  %v2011_v59 = vld [vmem:[%s3247_s8] ss:$0 sm:$0xff] }
 0x5fc   :  { %2614 = vmatprep.subr.mxu0 %v2710_v44 }
 0x5fd   :  { %2615 = vmatpush3.msra.mxu0 %v3006_v60 }
 0x694   :  { %v2502_v47 = vpop.f32.mrf.mxu1 }
 0x695   :  { %v1410_v53 = vadd.f32 %v2502_v47, %v2464_v45  ;;  %v1539_v45 = vld [vmem:[%s3248_s9] sm:$0x1]  ;;  %s2712_s9 = smov [#allocation7]  }
 0x696   :  { %v1404_v49 = vpop.f32.mrf.mxu1 }
 0x697   :  { %v1405_v54 = vadd.f32 %v1404_v49, %v1319_v46 }
 0x698   :  { %v2505_v51 = vpop.f32.mrf.mxu1 }
 0x699   :  { %v1420_v60 = vadd.f32 %v2505_v51, %v2467_v48  ;;  %v1540_v48 = vld [vmem:[%s3249_s10] sm:$0x1]  ;;  %s1966_s10 = sshll.u32 %s2712_s9, 4  ;;  %s1967_s10 = int_to_ptr.vmem [resolvable:$true] %s1966_s10 }
 0x69a   :  { %v1414_v55 = vpop.f32.mrf.mxu1  ;;  %s2680_s2 = scalar_lea.vmem %s1967_s10, 512  ;;  %p2685_p11 = scmp.lt.s32.totalorder %s1967_s10, %s1967_s10 }
 0x69b   :  { %v1415_v38 = vadd.f32 %v1414_v55, %v1329_v50  ;;  %p2681_p10 = scmp.ne.s32.totalorder %s1967_s10, %s2680_s2  ;;  %p2686_p12 = scmp.lt.s32.totalorder %s2680_s2, %s2680_s2 }
 0x69c   :  { %v2540_v52 = vpop.f32.mrf.mxu0 }
 0x69d   :  { %v1526_v57 = vadd.f32 %v2540_v52, %v1410_v53  ;;  %p2687_p13 = por %p2686_p12, %p2685_p11 }
 0x69e   :  { %v1506_v56 = vpop.f32.mrf.mxu0 }
 0x69f   :  { %v1525_v58 = vadd.f32 %v1506_v56, %v1405_v54  ;;  %v3192_v42 = vadd.f32 %v2011_v59, %v1526_v57  ;;  %p2688_p0 = pnand %p2687_p13, %p2681_p10 }
 0x6a0   :  { %v2543_v37 = vpop.f32.mrf.mxu0 }
 0x6a1   :  { %v3190_v39 = vadd.f32 %v2011_v59, %v1525_v58  ;;  %v1528_v43 = vadd.f32 %v2543_v37, %v1420_v60 }
 0x6a2   :  { %v1516_v40 = vpop.f32.mrf.mxu0 }
 0x6a3   :  { %v1527_v24 = vadd.f32 %v1516_v40, %v1415_v38  ;;  %v1541_v26 = vadd.f32 %v3192_v42, %v3190_v39  ;;  %v3198_v31 = vadd.f32 %v2011_v59, %v1528_v43 }
 0x6a5   :  { %v3196_v30 = vadd.f32 %v2011_v59, %v1527_v24 }
 0x6a7   :  { %v1542_v7 = vadd.f32 %v1541_v26, %v3196_v30 }
 0x6a9   :  { %v1543_v62 = vadd.f32 %v1542_v7, %v3198_v31 }
 0x6ab   :  { %v1544_v8 = vrot.slane %v1543_v62, 4 }
 0x6ad   :  { %v1545_v10 = vadd.f32 %v1544_v8, %v1543_v62 }
 0x6af   :  { %v1546_v11 = vrot.slane %v1545_v10, 2 }
 0x6b1   :  { %v1547_v0 = vadd.f32 %v1546_v11, %v1545_v10 }
 0x6b3   :  { %v1548_v1 = vrot.slane %v1547_v0, 1 }
 0x6b5   :  { %v1549_v13 = vadd.f32 %v1548_v1, %v1547_v0 }
 0x6b7   :  { %2577 = vmatmul.mubr.f32.vlgmr.msra.gmra.mxu1 %v1549_v13 }
 0x6b8   :  { %2580 = vmatpush3.msra.mxu1 %v3016_v61  ;;  %2581 = vmatprep.mubr.msk.f32.mxu1 %vm2711_vm2, %v2710_v44 }
 0x6b9   :  { %2619 = vmatprep.subr.mxu1 %v2710_v44 }
 0x777   :  { %v1616_v15 = vpop.f32.mrf.mxu1 }
 0x778   :  { %v1620_v3 = vmul.f32 0.001953125, %v1616_v15 }
 0x779   :  { %v2578_v4 = vpop.f32.mrf.mxu1 }
 0x77a   :  { %2582 = vmatmul.mubr.msk.f32.vlgmr.msra.gmra.mxu1 %vm712_vm3, %v1620_v3 }
 0x77b   :  { %2620 = vmatpush3.msra.mxu1 %v3016_v61  ;;  %2621 = vmatprep.mubr.msk.f32.mxu1 %vm2711_vm2, %v2710_v44 }
 0x77c   :  { %2624 = vmatprep.subr.mxu1 %v2710_v44 }
 0x83a   :  { %v1690_v18 = vpop.f32.mrf.mxu1 }
 0x83b   :  { %v1697_v5 = vrot.slane %v1690_v18, %v3077_v63 }
 0x83c   :  { %v2583_v6 = vpop.f32.mrf.mxu1 }
 0x83d   :  { %v1698_v9 = vsub.f32 %v3190_v39, %v1697_v5  ;;  %v1699_v12 = vsub.f32 %v3192_v42, %v1697_v5  ;;  %v1700_v14 = vsub.f32 %v3196_v30, %v1697_v5  ;;  %v1701_v16 = vsub.f32 %v3198_v31, %v1697_v5 }
 0x83f   :  { %v1702_v17 = vmul.f32 %v1698_v9, %v1698_v9  ;;  %v1703_v41 = vmul.f32 %v1699_v12, %v1699_v12  ;;  %v1704_v19 = vmul.f32 %v1700_v14, %v1700_v14  ;;  %v1705_v21 = vmul.f32 %v1701_v16, %v1701_v16 }
 0x841   :  { %v1706_v20 = vadd.f32 %v1703_v41, %v1702_v17 }
 0x843   :  { %v1707_v2 = vadd.f32 %v1706_v20, %v1704_v19 }
 0x845   :  { %v1708_v22 = vadd.f32 %v1707_v2, %v1705_v21 }
 0x847   :  { %v1709_v23 = vrot.slane %v1708_v22, 4 }
 0x849   :  { %v1710_v25 = vadd.f32 %v1709_v23, %v1708_v22 }
 0x84b   :  { %v1711_v27 = vrot.slane %v1710_v25, 2 }
 0x84d   :  { %v1712_v28 = vadd.f32 %v1711_v27, %v1710_v25 }
 0x84f   :  { %v1713_v29 = vrot.slane %v1712_v28, 1 }
 0x851   :  { %v1714_v32 = vadd.f32 %v1713_v29, %v1712_v28 }
 0x853   :  { %2617 = vmatmul.mubr.f32.vlgmr.msra.gmra.mxu0 %v1714_v32 }
 0x913   :  { %v1781_v33 = vpop.f32.mrf.mxu0 }
 0x914   :  { %v1785_v34 = vmul.f32 0.001953125, %v1781_v33 }
 0x915   :  { %v2618_v35 = vpop.f32.mrf.mxu0 }
 0x916   :  { %v1786_v36 = vadd.f32 1e-05, %v1785_v34 }
 0x918   :  { %2638 = vrsqrt.f32 %v1786_v36 }
 0x925   :  { %v2639_v46 = vpop.eup %2638 }
 0x926   :  { %v1788_v47 = vmul.f32 %v2639_v46, %v1539_v45 }
 0x928   :  { %2622 = vmatmul.mubr.msk.f32.vlgmr.msra.gmra.mxu1 %vm712_vm3, %v1788_v47  ;;  %v1789_v49 = vmul.f32 %v1788_v47, %v1620_v3 }
 0x929   :  { %2625 = vmatpush3.msra.mxu1 %v3016_v61  ;;  %2626 = vmatprep.mubr.msk.f32.mxu1 %vm2711_vm2, %v2710_v44 }
 0x92a   :  { %v1790_v50 = vsub.f32 %v1540_v48, %v1789_v49 }
 0x92c   :  { %2627 = vmatmul.mubr.msk.f32.vlgmr.msra.gmra.mxu1 %vm712_vm3, %v1790_v50 }
 0x9e8   :  { %v1860_v51 = vpop.f32.mrf.mxu1 }
 0x9e9   :  { %v1940_v52 = vrot.slane %v1860_v51, %v3077_v63 }
 0x9ea   :  { %v2623_v53 = vpop.f32.mrf.mxu1 }
 0x9eb   :  { %v1941_v54 = vmul.f32 %v1940_v52, %v3190_v39  ;;  %v1942_v56 = vmul.f32 %v1940_v52, %v3192_v42  ;;  %v1943_v57 = vmul.f32 %v1940_v52, %v3196_v30  ;;  %v1944_v58 = vmul.f32 %v1940_v52, %v3198_v31 }
 0x9ec   :  { %v1933_v55 = vpop.f32.mrf.mxu1 }
 0x9ed   :  { %v1948_v61 = vrot.slane %v1933_v55, %v3077_v63 }
 0x9ee   :  { %v2628_v59 = vpop.f32.mrf.mxu1 }
 0x9ef   :  { %v1949_v44 = vadd.f32 %v1948_v61, %v1941_v54  ;;  %v1950_v37 = vadd.f32 %v1948_v61, %v1942_v56  ;;  %v1951_v60 = vadd.f32 %v1948_v61, %v1943_v57  ;;  %v1952_v38 = vadd.f32 %v1948_v61, %v1944_v58 }
 0x9f1   :  { %v1953_v40 = vmax.f32 %v1949_v44, 0.0  ;;  %v1954_v43 = vmax.f32 %v1950_v37, 0.0  ;;  %v1955_v24 = vmax.f32 %v1951_v60, 0.0  ;;  %v1956_v39 = vmax.f32 %v1952_v38, 0.0 }
 0x9f3   :  { %1957 = vst [vmem:[#allocation7] sm:$0xff] %v1953_v40  ;;  %1958 = vst [vmem:[#allocation7 + $0x8] sm:$0xff] %v1954_v43 }
 0x9f4   :  { %1959 = vst [vmem:[#allocation7 + $0x10] sm:$0xff] %v1955_v24  ;;  %1960 = vst [vmem:[#allocation7 + $0x18] sm:$0xff] %v1956_v39 }
 0x9f5   :  { %2691 = shalt.err (!%p2688_p0)
}
 0x9f6   :  { %1972 = dma.vmem_to_hbm [thread:$0]  %s1967_s10, 512, %s3252_s13, [#allocation4], %s2707_s28, %s2707_s28, %s2708_s29  }
 0x9f7   :  { %2704 = dma.done.wait [#allocation4], 512  }
 0x9f8   :  { %2705 = vsyncadd [#allocation4], 4294966784 }
 0x9f9   :  { %1976 = vsyncpa [#allocation3], 1 }
 0x9fa   :  { %1977 = vsyncpa [#allocation6], 1 }
 0x9fb   :  { %1978 = vsyncpa [#allocation4], 1 }

</bundles_post_ra>
